<compile_context>
chip_gen: v6e
topology: v6e:2x2x1
jax: 0.10.0
libtpu: 0.0.40
codegen_flags: <defaults>
</compile_context>

<pallas_src>
import jax
import jax.numpy as jnp
from jax.experimental import pallas as pl
from jax.experimental.pallas import tpu as pltpu


def _triplet_accuracy_kernel(a_ref, p_ref, n_ref, o_ref, acc_ref):
    k = pl.program_id(1)                     # reduction (embedding-dim) axis, innermost

    @pl.when(k == 0)
    def _init():
        acc_ref[...] = jnp.zeros_like(acc_ref)

    a = a_ref[...].astype(jnp.float32)       # exact upcast; required on v5e, exact everywhere
    p = p_ref[...].astype(jnp.float32)
    n = n_ref[...].astype(jnp.float32)
    dp = a - p
    dn = a - n
    # Fused reduction: ||a-p||^2 < ||a-n||^2  <=>  sum(dp^2 - dn^2, axis=1) < 0.
    # One XLU cross-lane reduce per block instead of two; accumulation is exact f32.
    acc_ref[...] += jnp.sum(dp * dp - dn * dn, axis=1, keepdims=True)

    @pl.when(k == pl.num_programs(1) - 1)
    def _finalize():
        # int32 result column; cast to bool in the wrapper.  The narrow store is <1%
        # of total HBM traffic (B*4 bytes out vs 3*B*D*itemsize in), so we keep it
        # rather than paying / depending on a sublane->lane relayout for a lane-dense
        # output tile.
        o_ref[...] = (acc_ref[...] < 0.0).astype(jnp.int32)


def _device_kind():
    try:
        return jax.devices()[0].device_kind.lower()
    except Exception:
        return ""


def _is_multi_tensorcore_chip():
    """True for chips that expose >1 TensorCore to Mosaic (v7x).

    v5e/v6e are single-TC; v4/v5p megacore pairs are already handled by plain
    PARALLEL semantics, so only v7x opts into CORE_PARALLEL here.
    """
    kind = _device_kind()
    return ("v7" in kind) or ("7x" in kind)


def _vmem_capacity_bytes():
    """Per-TensorCore VMEM capacity; chip-aware fallback (64 MiB v7x, 128 MiB else)."""
    try:
        cap = getattr(pltpu.get_tpu_info(), "vmem_capacity_bytes", None)
        if cap:
            return int(cap)
    except Exception:
        pass
    kind = _device_kind()
    if ("v7" in kind) or ("7x" in kind):
        return 64 << 20
    return 128 << 20


def _sublane_align(itemsize):
    """Native second-minor tile for the dtype: 8 rows (f32), 16 (bf16), 32 (int8/fp8)."""
    return max(8, 32 // max(1, itemsize))


def _choose_blocks(B, D, itemsize, vmem_cap):
    """Pick (block_b, block_d) so the full working set fits comfortably in VMEM.

    Working set per grid step ~=
        3 inputs * 2 pipeline buffers * block_b*block_d*itemsize      (DMA tiles)
      + ~6 live f32 temporaries       * block_b*block_d*4             (upcasts/diffs/squares)
      + lane-padded (block_b, 1) accumulator + double-buffered output (~3*512 B/row)
    Target <= ~1/2 of VMEM capacity, leaving headroom under the scoped limit.
    """
    row_align = _sublane_align(itemsize)
    budget = vmem_cap // 2
    per_elem = 3 * 2 * itemsize + 6 * 4
    per_row_fixed = 3 * 512

    def rows_for(block_d):
        return budget // (block_d * per_elem + per_row_fixed)

    def round_rows(rows):
        if rows >= B:
            return B
        return max(row_align, (rows // row_align) * row_align)

    rows_full = rows_for(D)
    # Don't let a huge D squeeze the tile down to a handful of rows; prefer splitting D.
    min_rows = min(B, 8 * row_align)
    if rows_full >= min_rows:
        return round_rows(rows_full), D

    # Very large D: split the reduction over a second ("arbitrary") grid axis with a
    # per-row f32 accumulator.  block_d must be a multiple of 128 that divides D
    # exactly, so no padded garbage columns ever enter the accumulator.
    target_d = max(128, ((budget // min_rows - per_row_fixed) // per_elem) // 128 * 128)
    block_d = 0
    for steps in range(pl.cdiv(D, target_d), D // 128 + 1):
        if D % steps == 0 and (D // steps) % 128 == 0:
            block_d = D // steps
            break
    if block_d == 0:
        # No 128-aligned divisor of D: fall back to full-D blocks with few rows.
        return round_rows(max(rows_full, row_align)), D
    return round_rows(rows_for(block_d)), block_d


def _make_in_spec(block_b, block_d, buffer_count):
    index_map = lambda i, k: (i, k)
    if buffer_count is not None and buffer_count != 2:
        # Deeper pipelining: only useful when tiles are forced small (tiny B / huge D).
        return pl.BlockSpec((block_b, block_d), index_map,
                            pipeline_mode=pl.Buffered(buffer_count))
    return pl.BlockSpec((block_b, block_d), index_map)


def triplet_accuracy(anchor, positive, negative, *, block_b=None, block_d=None,
                     core_parallel=None, buffer_count=2):
    """Pallas equivalent of TripletAccuracy.forward.

    Returns a (B,) bool array: True where ||a-p||^2 < ||a-n||^2.
    Inputs may be float32 or bfloat16 (math is done in float32 inside the kernel).
    """
    assert anchor.ndim == 2
    assert anchor.shape == positive.shape == negative.shape
    assert positive.dtype == anchor.dtype and negative.dtype == anchor.dtype
    B, D = anchor.shape
    itemsize = jnp.dtype(anchor.dtype).itemsize

    vmem_cap = _vmem_capacity_bytes()
    auto_b, auto_d = _choose_blocks(B, D, itemsize, vmem_cap)
    block_b = min(B, block_b if block_b is not None else auto_b)
    block_d = min(D, block_d if block_d is not None else auto_d)

    # A split-D block must tile D exactly (a padded partial block would feed garbage
    # columns into the accumulator) and be 128-lane aligned; otherwise use full D.
    if block_d != D and (D % block_d != 0 or block_d % 128 != 0):
        block_d = D
    nb = pl.cdiv(B, block_b)
    nd = D // block_d
    grid = (nb, nd)

    # Engage both TensorCores on v7x; harmless PARALLEL elsewhere (single-TC v5e/v6e,
    # and v4/v5p megacore already splits PARALLEL axes).
    if core_parallel is None:
        core_parallel = _is_multi_tensorcore_chip() and nb >= 2
    batch_sem = pltpu.CORE_PARALLEL if core_parallel else pltpu.PARALLEL

    cost = pl.CostEstimate(
        flops=7 * B * D,
        transcendentals=0,
        bytes_accessed=3 * B * D * itemsize + B * 4,
    )

    out = pl.pallas_call(
        _triplet_accuracy_kernel,
        out_shape=jax.ShapeDtypeStruct((B, 1), jnp.int32),
        grid_spec=pltpu.PrefetchScalarGridSpec(
            num_scalar_prefetch=0,
            grid=grid,
            in_specs=[
                _make_in_spec(block_b, block_d, buffer_count),
                _make_in_spec(block_b, block_d, buffer_count),
                _make_in_spec(block_b, block_d, buffer_count),
            ],
            out_specs=pl.BlockSpec((block_b, 1), lambda i, k: (i, 0)),
            scratch_shapes=[pltpu.VMEM((block_b, 1), jnp.float32)],
        ),
        compiler_params=pltpu.CompilerParams(
            dimension_semantics=(batch_sem, pltpu.ARBITRARY),
            vmem_limit_bytes=int(vmem_cap * 3 // 4),
        ),
        cost_estimate=cost,
    )(anchor, positive, negative)

    return out[:, 0].astype(jnp.bool_)


def _reference(anchor, positive, negative):
    a = anchor.astype(jnp.float32)
    p = positive.astype(jnp.float32)
    n = negative.astype(jnp.float32)
    dist_pos = jnp.sum((a - p) ** 2, axis=1)
    dist_neg = jnp.sum((a - n) ** 2, axis=1)
    return dist_pos < dist_neg


if __name__ == "__main__":
    # Case 1: small shapes consistent with the module (single block, grid=(1, 1)).
    k_a, k_p, k_n = jax.random.split(jax.random.PRNGKey(0), 3)
    B, D = 8, 32
    anchor = jax.random.normal(k_a, (B, D), dtype=jnp.float32)
    positive = jax.random.normal(k_p, (B, D), dtype=jnp.float32)
    negative = jax.random.normal(k_n, (B, D), dtype=jnp.float32)

    result = triplet_accuracy(anchor, positive, negative)
    jax.block_until_ready(result)
    ref = _reference(anchor, positive, negative)
    assert result.shape == (B,)
    assert result.dtype == jnp.bool_
    assert bool(jnp.all(result == ref))

    # Case 2: batch-tiled, pipelined path (grid=(2, 1)).
    k_a2, k_p2, k_n2 = jax.random.split(jax.random.PRNGKey(1), 3)
    B2, D2 = 256, 128
    a2 = jax.random.normal(k_a2, (B2, D2), dtype=jnp.float32)
    p2 = jax.random.normal(k_p2, (B2, D2), dtype=jnp.float32)
    n2 = jax.random.normal(k_n2, (B2, D2), dtype=jnp.float32)
    r2 = triplet_accuracy(a2, p2, n2, block_b=128)
    jax.block_until_ready(r2)
    assert bool(jnp.all(r2 == _reference(a2, p2, n2)))

    # Case 3: bf16 inputs + split-D reduction path with accumulator (grid=(1, 2)).
    k_a3, k_p3, k_n3 = jax.random.split(jax.random.PRNGKey(2), 3)
    B3, D3 = 64, 512
    a3 = jax.random.normal(k_a3, (B3, D3), dtype=jnp.bfloat16)
    p3 = jax.random.normal(k_p3, (B3, D3), dtype=jnp.bfloat16)
    n3 = jax.random.normal(k_n3, (B3, D3), dtype=jnp.bfloat16)
    r3 = triplet_accuracy(a3, p3, n3, block_d=256)
    jax.block_until_ready(r3)
    assert bool(jnp.all(r3 == _reference(a3, p3, n3)))

    print("KERNEL_OK")
</pallas_src>

<mosaic_0001>
module attributes {stable_mosaic.version = 11 : i64} {
  func.func @_triplet_accuracy_kernel(%arg0: i32, %arg1: i32, %arg2: memref<8x32xf32, #tpu.memory_space<vmem>>, %arg3: memref<8x32xf32, #tpu.memory_space<vmem>>, %arg4: memref<8x32xf32, #tpu.memory_space<vmem>>, %arg5: memref<8x1xi32, #tpu.memory_space<vmem>>, %arg6: memref<8x1xf32, #tpu.memory_space<vmem>>) attributes {dimension_semantics = [#tpu.dimension_semantics<parallel>, #tpu.dimension_semantics<arbitrary>], iteration_bounds = array<i64: 1, 1>, scalar_prefetch = 0 : i64, scratch_operands = 1 : i64, tpu.core_type = #tpu.core_type<tc>, window_params = [{transform_indices = @transform_0, window_bounds = array<i64: 8, 32>}, {transform_indices = @transform_1, window_bounds = array<i64: 8, 32>}, {transform_indices = @transform_2, window_bounds = array<i64: 8, 32>}, {transform_indices = @transform_3, window_bounds = array<i64: 8, 1>}]} {
    %c0_i32 = arith.constant 0 : i32
    %0 = arith.cmpi eq, %arg1, %c0_i32 : i32
    %1 = arith.extui %0 : i1 to i32
    %c0_i32_0 = arith.constant 0 : i32
    %2 = arith.cmpi ne, %1, %c0_i32_0 : i32
    scf.if %2 {
      %cst_12 = arith.constant 0.000000e+00 : f32
      %19 = vector.broadcast %cst_12 : f32 to vector<8x1xf32>
      %c0_13 = arith.constant 0 : index
      %c0_14 = arith.constant 0 : index
      %20 = vector.load %arg6[%c0_13, %c0_14] : memref<8x1xf32, #tpu.memory_space<vmem>>, vector<8x1xf32>
      tpu.vector_store %arg6[%c0_13, %c0_14], %19 {strides = array<i32>} : memref<8x1xf32, #tpu.memory_space<vmem>>, vector<8x1xf32>,
    } else {
    }
    %c0 = arith.constant 0 : index
    %c0_1 = arith.constant 0 : index
    %3 = vector.load %arg2[%c0, %c0_1] : memref<8x32xf32, #tpu.memory_space<vmem>>, vector<8x32xf32>
    %c0_2 = arith.constant 0 : index
    %c0_3 = arith.constant 0 : index
    %4 = vector.load %arg3[%c0_2, %c0_3] : memref<8x32xf32, #tpu.memory_space<vmem>>, vector<8x32xf32>
    %c0_4 = arith.constant 0 : index
    %c0_5 = arith.constant 0 : index
    %5 = vector.load %arg4[%c0_4, %c0_5] : memref<8x32xf32, #tpu.memory_space<vmem>>, vector<8x32xf32>
    %6 = arith.subf %3, %4 : vector<8x32xf32>
    %7 = arith.subf %3, %5 : vector<8x32xf32>
    %c0_6 = arith.constant 0 : index
    %c0_7 = arith.constant 0 : index
    %8 = vector.load %arg6[%c0_6, %c0_7] : memref<8x1xf32, #tpu.memory_space<vmem>>, vector<8x1xf32>
    %9 = arith.mulf %6, %6 : vector<8x32xf32>
    %10 = arith.mulf %7, %7 : vector<8x32xf32>
    %11 = arith.subf %9, %10 : vector<8x32xf32>
    %cst = arith.constant dense<0.000000e+00> : vector<8xf32>
    %12 = vector.multi_reduction <add>, %11, %cst [1] : vector<8x32xf32> to vector<8xf32>
    %13 = vector.shape_cast %12 : vector<8xf32> to vector<8x1xf32>
    %14 = arith.addf %8, %13 : vector<8x1xf32>
    %c0_8 = arith.constant 0 : index
    %c0_9 = arith.constant 0 : index
    %15 = vector.load %arg6[%c0_8, %c0_9] : memref<8x1xf32, #tpu.memory_space<vmem>>, vector<8x1xf32>
    tpu.vector_store %arg6[%c0_8, %c0_9], %14 {strides = array<i32>} : memref<8x1xf32, #tpu.memory_space<vmem>>, vector<8x1xf32>,
    %c0_i32_10 = arith.constant 0 : i32
    %16 = arith.cmpi eq, %arg1, %c0_i32_10 : i32
    %17 = arith.extui %16 : i1 to i32
    %c0_i32_11 = arith.constant 0 : i32
    %18 = arith.cmpi ne, %17, %c0_i32_11 : i32
    scf.if %18 {
      %c0_12 = arith.constant 0 : index
      %c0_13 = arith.constant 0 : index
      %19 = vector.load %arg6[%c0_12, %c0_13] : memref<8x1xf32, #tpu.memory_space<vmem>>, vector<8x1xf32>
      %cst_14 = arith.constant 0.000000e+00 : f32
      %20 = vector.broadcast %cst_14 : f32 to vector<8x1xf32>
      %21 = arith.cmpf olt, %19, %20 : vector<8x1xf32>
      %22 = arith.extui %21 : vector<8x1xi1> to vector<8x1xi32>
      %c0_15 = arith.constant 0 : index
      %c0_16 = arith.constant 0 : index
      %23 = vector.load %arg5[%c0_15, %c0_16] : memref<8x1xi32, #tpu.memory_space<vmem>>, vector<8x1xi32>
      tpu.vector_store %arg5[%c0_15, %c0_16], %22 {strides = array<i32>} : memref<8x1xi32, #tpu.memory_space<vmem>>, vector<8x1xi32>,
    } else {
    }
    return
  }
  func.func @transform_0(%arg0: i32, %arg1: i32) -> (i32, i32) {
    %c0_i32 = arith.constant 0 : i32
    return %arg0, %arg1 : i32, i32
  }
  func.func @transform_1(%arg0: i32, %arg1: i32) -> (i32, i32) {
    %c0_i32 = arith.constant 0 : i32
    return %arg0, %arg1 : i32, i32
  }
  func.func @transform_2(%arg0: i32, %arg1: i32) -> (i32, i32) {
    %c0_i32 = arith.constant 0 : i32
    return %arg0, %arg1 : i32, i32
  }
  func.func @transform_3(%arg0: i32, %arg1: i32) -> (i32, i32) {
    %c0_i32 = arith.constant 0 : i32
    %c0_i32_0 = arith.constant 0 : i32
    return %arg0, %c0_i32 : i32, i32
  }
}

</mosaic_0001>

<bundles_post_ra>
// kernel: tpu_custom_call.1
= control target key start
LH: loop header
LB: loop body
LE: loop exit
PB: predicated region body
PF: predicated region fallthrough
CT: control target
= control target key end

     0   :  { %8 = vsyncpa [#allocation4], 0  ;;  %s193_s0 = inlined_call_operand.hbm [shape: f32[8,32], index: 0, kind: input, shape index: {}]   ;;  %s194_s1 = inlined_call_operand.hbm [shape: f32[8,32], index: 1, kind: input, shape index: {}]   ;;  %s195_s2 = inlined_call_operand.hbm [shape: f32[8,32], index: 2, kind: input, shape index: {}]   ;;  %s196_s3 = inlined_call_operand.vmem [shape: s32[8,1], index: 3, kind: output, shape index: {}]  }
   0x1   :  { %9 = vsyncpa [#allocation6], 0  ;;  %s153_s12 = smov [#allocation5]   ;;  %s154_s14 = smov [#allocation3]  }
   0x2   :  { %s26_s13 = sshll.u32 %s153_s12, 4  ;;  %s16_s15 = sshll.u32 %s154_s14, 4  ;;  %s27_s13 = int_to_ptr.vmem [resolvable:$true] %s26_s13  ;;  %s17_s15 = int_to_ptr.vmem [resolvable:$true] %s16_s15 }
   0x3   :  { %s97_s16 = scalar_lea.vmem %s27_s13, 128  ;;  %p102_p1 = scmp.lt.s32.totalorder %s27_s13, %s27_s13 }
   0x4   :  { %p98_p0 = scmp.ne.s32.totalorder %s27_s13, %s97_s16  ;;  %p103_p2 = scmp.lt.s32.totalorder %s97_s16, %s97_s16 }
   0x6   :  { %p104_p3 = por %p103_p2, %p102_p1 }
   0x8   :  { %p105_p4 = pnand %p104_p3, %p98_p0 }
   0xa   :  { %108 = shalt.err (!%p105_p4)
}
   0xb   :  { %29 = dma.hbm_to_vmem [thread:$0]  %s194_s1, 128, %s27_s13, [#allocation6]  }
   0xc   :  { %s117_s19 = scalar_lea.vmem %s17_s15, 128  ;;  %p122_p6 = scmp.lt.s32.totalorder %s17_s15, %s17_s15 }
   0xd   :  { %p118_p5 = scmp.ne.s32.totalorder %s17_s15, %s117_s19  ;;  %p123_p7 = scmp.lt.s32.totalorder %s117_s19, %s117_s19 }
   0xf   :  { %p124_p8 = por %p123_p7, %p122_p6 }
  0x11   :  { %p125_p9 = pnand %p124_p8, %p118_p5 }
  0x13   :  { %128 = shalt.err (!%p125_p9)
}
  0x14   :  { %19 = dma.hbm_to_vmem [thread:$0]  %s193_s0, 128, %s17_s15, [#allocation4]  }
  0x15   :  { %s155_s22 = smov [#allocation7]  }
  0x16   :  { %s36_s23 = sshll.u32 %s155_s22, 4  ;;  %s37_s23 = int_to_ptr.vmem [resolvable:$true] %s36_s23 }
  0x17   :  { %s137_s24 = scalar_lea.vmem %s37_s23, 128  ;;  %p142_p11 = scmp.lt.s32.totalorder %s37_s23, %s37_s23 }
  0x18   :  { %p138_p10 = scmp.ne.s32.totalorder %s37_s23, %s137_s24  ;;  %p143_p12 = scmp.lt.s32.totalorder %s137_s24, %s137_s24 }
  0x1a   :  { %p144_p13 = por %p143_p12, %p142_p11 }
  0x1c   :  { %p145_p0 = pnand %p144_p13, %p138_p10 }
  0x1e   :  { %148 = shalt.err (!%p145_p0)
}
  0x1f   :  { %39 = dma.hbm_to_vmem [thread:$0]  %s195_s2, 128, %s37_s23, [#allocation6]  }
  0x20   :  { %149 = dma.done.wait [#allocation4], 128  }
  0x21   :  { %150 = vsyncadd [#allocation4], 4294967168 }
  0x22   :  { %151 = dma.done.wait [#allocation6], 256  }
  0x23   :  { %152 = vsyncadd [#allocation6], 4294967040  ;;  %vm53_vm0 = vcmask 7168   ;;  %v156_v0 = vmov 0.0   ;;  %v55_v1 = vld [vmem:[#allocation3] sm:$0xff]  ;;  %v56_v2 = vld [vmem:[#allocation5] sm:$0xff] }
  0x24   :  { %54 = vst.msk [vmem:[#allocation2] sm:$0xff] %vm53_vm0, %v156_v0  ;;  %v57_v3 = vld [vmem:[#allocation7] sm:$0xff]  ;;  %v58_v4 = vsub.f32 %v55_v1, %v56_v2  ;;  %vm64_vm1 = vcmask 261120   ;;  %v157_v14 = vmov 0  }
  0x25   :  { %v59_v5 = vsub.f32 %v55_v1, %v57_v3 }
  0x26   :  { %v61_v6 = vmul.f32 %v58_v4, %v58_v4 }
  0x27   :  { %v62_v7 = vmul.f32 %v59_v5, %v59_v5 }
  0x29   :  { %v63_v8 = vsub.f32 %v61_v6, %v62_v7 }
  0x2b   :  { %v65_v9 = vsel %vm64_vm1, %v63_v8, 0.0  ;;  %v60_v10 = vld [vmem:[#allocation2] sm:$0xff] }
  0x2c   :  { %66 = vadd.xlane.f32.xlu0 %v65_v9 }
  0xb5   :  { %v67_v11 = vpop.xlane.xlu0 %66 }
  0xb6   :  { %v68_v12 = vadd.f32 %v67_v11, %v60_v10 }
  0xb8   :  { %70 = vst.msk [vmem:[#allocation2] sm:$0xff] %vm53_vm0, %v68_v12 }
  0xbf   :  { %v74_v13 = vld [vmem:[#allocation2] sm:$0xff] }
  0xc0   :  { %vm75_vm2 = vcmp.lt.f32.partialorder %v74_v13, 0.0 }
  0xc1   :  { %v76_v15 = vsel %vm75_vm2, 1, %v157_v14 }
  0xc2   :  { %77 = vst.msk [vmem:[%s196_s3] sm:$0xff] %vm53_vm0, %v76_v15 }
  0xc3   :  { %82 = vsyncpa [#allocation4], 1 }
  0xc4   :  { %83 = vsyncpa [#allocation6], 1 }

</bundles_post_ra>
